<compile_context>
chip_gen: v7x
topology: tpu7x:2x2x1
jax: 0.10.0
libtpu: 0.0.40
codegen_flags: <defaults>
</compile_context>

<pallas_src>
import jax
import jax.numpy as jnp
from jax.experimental import pallas as pl
from jax.experimental.pallas import tpu as pltpu


def _cdiv(a: int, b: int) -> int:
    return (a + b - 1) // b


def _round_up(a: int, b: int) -> int:
    return _cdiv(a, b) * b


def _pick_row_tile(R: int, L: int, tile_bytes: int):
    """Rows per grid step (multiple of 8, <= R) and resulting block count."""
    if R <= 8:
        return R, 1                                  # single full-extent block
    # Budget against an f32-accumulation footprint; cap at 2048 rows so large
    # problems still expose several parallel grid steps (megacore) and the
    # double-buffered input stays far below scoped-VMEM defaults on all gens.
    rows = max(8, min(2048, tile_bytes // (L * 4)))
    rows = (rows // 128) * 128 if rows >= 128 else (rows // 8) * 8
    tm = min(rows, (R // 8) * 8)                     # keep tm <= R, multiple of 8
    nb = _cdiv(R, tm)
    # Rebalance so the ragged last block is not tiny; keep lane-dense (x128)
    # output stores whenever tiles are wide.
    gran = 128 if tm >= 128 else 8
    tm = min(_round_up(_cdiv(R, nb), gran), (R // 8) * 8)
    return tm, _cdiv(R, tm)


def _gap_rows_kernel(x_ref, o_ref):
    # x_ref: (TM, L)  rows of flattened (H*W) spatial values
    # o_ref: (1, TM)  lane-dense row-means for this block
    x = x_ref[...].astype(jnp.float32)
    tm, l = x.shape
    s = jnp.sum(x, axis=-1)                          # lane-axis (XLU) reduction
    o_ref[...] = (s * (1.0 / l)).astype(o_ref.dtype).reshape(1, tm)


def flatten_forward(x, *, tile_bytes=4 * 1024 * 1024):
    """AdaptiveAvgPool2d((1,1)) + flatten: (N, C, H, W) -> (N, C)."""
    N, C, H, W = x.shape
    R = N * C
    L = H * W
    itemsize = jnp.dtype(x.dtype).itemsize

    tm, num_blocks = _pick_row_tile(R, L, tile_bytes)

    # Free reshape for contiguous NCHW; no padding pass (ragged last block is
    # handled by Pallas, invalid rows are discarded by the final slice).
    x2 = x.reshape(R, L)
    # TODO(synk): for extremely large spatial maps (H*W > ~128K) a second,
    # reduction grid axis over L would be needed to keep the block in VMEM.

    out = pl.pallas_call(
        _gap_rows_kernel,
        out_shape=jax.ShapeDtypeStruct((num_blocks, tm), x.dtype),
        grid_spec=pltpu.PrefetchScalarGridSpec(
            num_scalar_prefetch=0,
            grid=(num_blocks,),
            in_specs=[pl.BlockSpec((tm, L), lambda i: (i, 0))],
            out_specs=pl.BlockSpec((1, tm), lambda i: (i, 0)),
        ),
        compiler_params=pltpu.CompilerParams(
            dimension_semantics=("parallel",),
        ),
        cost_estimate=pl.CostEstimate(
            flops=R * L,
            transcendentals=0,
            bytes_accessed=R * L * itemsize + R * itemsize,
        ),
    )(x2)

    return out.reshape(-1)[:R].reshape(N, C)


def _check(x):
    out = jax.block_until_ready(flatten_forward(x))
    ref = jnp.mean(x.astype(jnp.float32), axis=(2, 3)).astype(x.dtype)
    assert out.shape == (x.shape[0], x.shape[1]), out.shape
    assert jnp.allclose(out.astype(jnp.float32), ref.astype(jnp.float32),
                        atol=1e-5, rtol=1e-5), "mismatch vs reference"


if __name__ == "__main__":
    key = jax.random.PRNGKey(0)

    # primary small test, matching a conv feature map (NCHW)
    x = jax.random.normal(key, (2, 4, 16, 16), dtype=jnp.float32)
    _check(x)

    # non-multiple-of-8 row count + non-128 spatial dim (ragged last block)
    k1, k2 = jax.random.split(key)
    _check(jax.random.normal(k1, (3, 5, 7, 7), dtype=jnp.float32))

    # multi-block grid path (rebalanced 128-multiple tiles + ragged tail)
    _check(jax.random.normal(k2, (2, 1100, 4, 4), dtype=jnp.float32))

    print("KERNEL_OK")
</pallas_src>

<mosaic_0001>
module attributes {stable_mosaic.version = 11 : i64} {
  func.func @_gap_rows_kernel(%arg0: i32, %arg1: memref<8x256xf32, #tpu.memory_space<vmem>>, %arg2: memref<1x8xf32, #tpu.memory_space<vmem>>) attributes {dimension_semantics = [#tpu.dimension_semantics<parallel>], iteration_bounds = array<i64: 1>, scalar_prefetch = 0 : i64, scratch_operands = 0 : i64, tpu.core_type = #tpu.core_type<tc>, window_params = [{transform_indices = @transform_0, window_bounds = array<i64: 8, 256>}, {transform_indices = @transform_1, window_bounds = array<i64: 1, 8>}]} {
    %c0 = arith.constant 0 : index
    %c0_0 = arith.constant 0 : index
    %0 = vector.load %arg1[%c0, %c0_0] : memref<8x256xf32, #tpu.memory_space<vmem>>, vector<8x256xf32>
    %cst = arith.constant dense<0.000000e+00> : vector<8xf32>
    %1 = vector.multi_reduction <add>, %0, %cst [1] : vector<8x256xf32> to vector<8xf32>
    %cst_1 = arith.constant 3.906250e-03 : f32
    %2 = vector.broadcast %cst_1 : f32 to vector<8xf32>
    %3 = arith.mulf %1, %2 : vector<8xf32>
    %4 = vector.shape_cast %3 : vector<8xf32> to vector<1x8xf32>
    %c0_2 = arith.constant 0 : index
    %c0_3 = arith.constant 0 : index
    %5 = vector.load %arg2[%c0_2, %c0_3] : memref<1x8xf32, #tpu.memory_space<vmem>>, vector<1x8xf32>
    tpu.vector_store %arg2[%c0_2, %c0_3], %4 {strides = array<i32>} : memref<1x8xf32, #tpu.memory_space<vmem>>, vector<1x8xf32>,
    return
  }
  func.func @transform_0(%arg0: i32) -> (i32, i32) {
    %c0_i32 = arith.constant 0 : i32
    %c0_i32_0 = arith.constant 0 : i32
    return %arg0, %c0_i32 : i32, i32
  }
  func.func @transform_1(%arg0: i32) -> (i32, i32) {
    %c0_i32 = arith.constant 0 : i32
    %c0_i32_0 = arith.constant 0 : i32
    return %arg0, %c0_i32 : i32, i32
  }
}

</mosaic_0001>

<bundles_post_ra>
// kernel: tpu_custom_call.1
= control target key start
LH: loop header
LB: loop body
LE: loop exit
PB: predicated region body
PF: predicated region fallthrough
CT: control target
= control target key end

     0   :  { %6 = vsyncpa [#allocation3], 0  ;;  %s138_s0 = inlined_call_operand.hbm [shape: f32[8,256], index: 0, kind: input, shape index: {}]   ;;  %s139_s1 = inlined_call_operand.hbm [shape: f32[1,8], index: 1, kind: output, shape index: {}]  }
   0x1   :  { %7 = vsyncpa [#allocation4], 0  ;;  %s102_s6 = smov [#allocation2]   ;;  %s54_s10 = scalar_lea.hbm %s138_s0, 256 }
   0x2   :  { %s14_s7 = sshll.u32 %s102_s6, 4  ;;  %p55_p0 = scmp.ne.s32.totalorder %s138_s0, %s54_s10  ;;  %s15_s7 = int_to_ptr.vmem [resolvable:$true] %s14_s7 }
   0x3   :  { %p58_p1 = scmp.lt.u32.totalorder %s54_s10, %s138_s0 }
   0x5   :  { %p60_p2 = pnand %p58_p1, %p55_p0 }
   0x7   :  { %63 = shalt.err (!%p60_p2)
}
   0x8   :  { %s64_s15 = scalar_lea.vmem %s15_s7, 256  ;;  %p69_p4 = scmp.lt.s32.totalorder %s15_s7, %s15_s7 }
   0x9   :  { %p65_p3 = scmp.ne.s32.totalorder %s15_s7, %s64_s15  ;;  %p70_p5 = scmp.lt.s32.totalorder %s64_s15, %s64_s15 }
   0xb   :  { %p71_p6 = por %p70_p5, %p69_p4 }
   0xd   :  { %p72_p7 = pnand %p71_p6, %p65_p3 }
   0xf   :  { %75 = shalt.err (!%p72_p7)
}
  0x10   :  { %17 = dma.hbm_to_vmem [thread:$0]  %s138_s0, 256, %s15_s7, [#allocation3]  }
  0x11   :  { %98 = dma.done.wait [#allocation3], 256  }
  0x12   :  { %99 = vsyncadd [#allocation3], 4294967040  ;;  %v21_v0 = vld [vmem:[#allocation2] sm:$0xff]  ;;  %v22_v1 = vld [vmem:[#allocation2 + $0x8] sm:$0xff]  ;;  %v28_v3 = vlaneseq  ;;  %s103_s18 = smov [#allocation5]   ;;  %vm35_vm0 = vcmask 57344  }
  0x13   :  { %v23_v2 = vadd.f32 %v22_v1, %v21_v0  ;;  %s43_s19 = sshll.u32 %s103_s18, 4  ;;  %s44_s19 = int_to_ptr.vmem [resolvable:$true] %s43_s19 }
  0x14   :  { %v29_v4 = vand.u32 127, %v28_v3  ;;  %v31_v5 = vshrl.u32 %v28_v3, 7  ;;  %s76_s20 = scalar_lea.vmem %s44_s19, 16  ;;  %s80_s0 = scalar_lea.vmem %s44_s19, 32 }
  0x15   :  { %24 = vadd.xlane.f32.xlu0 %v23_v2  ;;  %p77_p8 = scmp.ne.s32.totalorder %s44_s19, %s76_s20  ;;  %p81_p9 = scmp.lt.s32.totalorder %s44_s19, %s44_s19 }
  0x16   :  { %v32_v6 = vsub.s32 %v29_v4, %v31_v5  ;;  %p82_p10 = scmp.lt.s32.totalorder %s80_s0, %s76_s20 }
  0x18   :  { %p83_p11 = por %p82_p10, %p81_p9 }
  0x1a   :  { %p84_p12 = pnand %p83_p11, %p77_p8 }
  0xa2   :  { %v25_v7 = vpop.xlane.xlu0 %24 }
  0xa3   :  { %v26_v8 = vmul.f32 0.00390625, %v25_v7 }
  0xa5   :  { %v33_v9 = vrot.slane %v26_v8, %v32_v6 }
  0xa7   :  { %36 = vst.msk [vmem:[#allocation5] sm:$0x1] %vm35_vm0, %v33_v9 }
  0xa8   :  { %87 = shalt.err (!%p84_p12)
}
  0xa9   :  { %s88_s23 = scalar_lea.hbm %s139_s1, 16 }
  0xaa   :  { %p89_p13 = scmp.ne.s32.totalorder %s139_s1, %s88_s23  ;;  %p92_p0 = scmp.lt.u32.totalorder %s88_s23, %s139_s1 }
  0xac   :  { %p94_p1 = pnand %p92_p0, %p89_p13 }
  0xae   :  { %97 = shalt.err (!%p94_p1)
}
  0xaf   :  { %46 = dma.vmem_to_hbm [thread:$0]  %s44_s19, 16, %s139_s1, [#allocation4]  }
  0xb0   :  { %100 = dma.done.wait [#allocation4], 16  }
  0xb1   :  { %101 = vsyncadd [#allocation4], 4294967280 }
  0xb2   :  { %50 = vsyncpa [#allocation3], 1 }
  0xb3   :  { %51 = vsyncpa [#allocation4], 1 }

</bundles_post_ra>
